<compile_context>
chip_gen: v5e
topology: v5e:2x2
jax: 0.10.0
libtpu: 0.0.40
codegen_flags: <defaults>
</compile_context>

<pallas_src>
import functools

import jax
import jax.numpy as jnp
from jax.experimental import pallas as pl
from jax.experimental.pallas import tpu as pltpu

LOG_STD_MIN = -20.0
LOG_STD_MAX = 2.0

_LANE = 128
_SUBLANE = 8


def _round_up(x, m):
    return ((x + m - 1) // m) * m


def _cdiv(a, b):
    return -(-a // b)


def _batch_tiling(batch, sublane, tm_target=1024):
    """Balanced batch tiling: (TM, padded_batch, n_tiles)."""
    n_tiles = max(1, _cdiv(batch, tm_target))
    # v7x: keep >= 2 grid steps for batches big enough to split, so the
    # "parallel" batch axis can shard across both TensorCores.
    if n_tiles == 1 and batch > sublane:
        n_tiles = 2
    tm = _round_up(_cdiv(batch, n_tiles), sublane)
    # Rounding TM up may let fewer tiles cover the batch; drop dead tiles.
    while n_tiles > 1 and tm * (n_tiles - 1) >= batch:
        n_tiles -= 1
    return tm, tm * n_tiles, n_tiles


def _actor_sac_kernel(x_ref, w1_ref, b1_ref, w2_ref, b2_ref, wh_ref, bh_ref,
                      lo_ref, hi_ref, out_ref):
    # Cast the activation tile to the MXU operand dtype (bf16 on the fast
    # path); all accumulation / bias / relu / clamp stay in f32.
    x = x_ref[...].astype(w1_ref.dtype)

    # fc1 + relu
    h1 = jnp.dot(x, w1_ref[...], preferred_element_type=jnp.float32)
    h1 = jnp.maximum(h1 + b1_ref[...], 0.0).astype(w2_ref.dtype)

    # fc2 + relu
    h2 = jnp.dot(h1, w2_ref[...], preferred_element_type=jnp.float32)
    h2 = jnp.maximum(h2 + b2_ref[...], 0.0).astype(wh_ref.dtype)

    # fused heads: cols [0:A) = mean, [A:2A) = log_std, rest = lane padding
    heads = jnp.dot(h2, wh_ref[...], preferred_element_type=jnp.float32)
    heads = heads + bh_ref[...]

    # Per-column clamp rows: (+-f32max) on mean/padding columns (no-op),
    # (LOG_STD_MIN, LOG_STD_MAX) on the log_std columns.
    heads = jnp.minimum(jnp.maximum(heads, lo_ref[...]), hi_ref[...])

    out_ref[...] = heads.astype(out_ref.dtype)


def prepare_actor_sac_params(params, compute_dtype=jnp.bfloat16):
    """One-time padding + head fusion of the raw [in, out] weights.

    Call once after (re)initializing / updating the raw params; the returned
    slabs are what actor_sac_forward consumes every step.
    """
    w1, b1 = params["w1"], params["b1"]
    w2, b2 = params["w2"], params["b2"]
    wm, bm = params["wm"], params["bm"]
    ws, bs = params["ws"], params["bs"]

    S, H = w1.shape
    H2 = w2.shape[1]
    A = wm.shape[1]

    Hp = _round_up(H, _LANE)
    H2p = _round_up(H2, _LANE)
    Op = _round_up(2 * A, _LANE)  # fused, lane-dense head output width

    f32 = jnp.float32
    big = float(jnp.finfo(f32).max)

    # Zero padding is exact: zero rows/cols are no-ops through matmul + relu.
    w1_p = jnp.zeros((S, Hp), compute_dtype).at[:, :H].set(w1.astype(compute_dtype))
    b1_p = jnp.zeros((1, Hp), f32).at[:, :H].set(b1.astype(f32))
    w2_p = jnp.zeros((Hp, H2p), compute_dtype).at[:H, :H2].set(w2.astype(compute_dtype))
    b2_p = jnp.zeros((1, H2p), f32).at[:, :H2].set(b2.astype(f32))
    wh_p = (jnp.zeros((H2p, Op), compute_dtype)
            .at[:H2, :A].set(wm.astype(compute_dtype))
            .at[:H2, A:2 * A].set(ws.astype(compute_dtype)))
    bh_p = (jnp.zeros((1, Op), f32)
            .at[:, :A].set(bm.astype(f32))
            .at[:, A:2 * A].set(bs.astype(f32)))
    lo = jnp.full((1, Op), -big, f32).at[:, A:2 * A].set(LOG_STD_MIN)
    hi = jnp.full((1, Op), big, f32).at[:, A:2 * A].set(LOG_STD_MAX)

    return {"w1": w1_p, "b1": b1_p, "w2": w2_p, "b2": b2_p,
            "wh": wh_p, "bh": bh_p, "lo": lo, "hi": hi}


@functools.partial(jax.jit, static_argnames=("action_dim",))
def actor_sac_forward(state, prepared, *, action_dim):
    """state: [B, state_dim] -> (mean [B, A], log_std [B, A]), both f32."""
    w1_p, b1_p = prepared["w1"], prepared["b1"]
    w2_p, b2_p = prepared["w2"], prepared["b2"]
    wh_p, bh_p = prepared["wh"], prepared["bh"]
    lo, hi = prepared["lo"], prepared["hi"]

    B, S = state.shape
    assert w1_p.shape[0] == S, "prepared params do not match state_dim"
    Hp = w1_p.shape[1]
    H2p = w2_p.shape[1]
    Op = wh_p.shape[1]

    # bf16 operands prefer sublane multiples of 16 for the batch tile.
    sublane = 16 if w1_p.dtype == jnp.bfloat16 else _SUBLANE
    TM, Bp, n_tiles = _batch_tiling(B, sublane)

    # Only the batch dim of x is (lightly) padded; the feature dim stays at S.
    x_p = state if Bp == B else jnp.zeros((Bp, S), state.dtype).at[:B].set(state)

    out = pl.pallas_call(
        _actor_sac_kernel,
        out_shape=jax.ShapeDtypeStruct((Bp, Op), jnp.float32),
        grid=(n_tiles,),
        in_specs=[
            # activations: tiled over batch; full-extent (unpadded) last dim
            pl.BlockSpec((TM, S), lambda i: (i, 0)),
            # weights / biases / clamp rows: constant block index -> stay
            # VMEM-resident across grid steps, no re-DMA.
            pl.BlockSpec((S, Hp), lambda i: (0, 0)),
            pl.BlockSpec((1, Hp), lambda i: (0, 0)),
            pl.BlockSpec((Hp, H2p), lambda i: (0, 0)),
            pl.BlockSpec((1, H2p), lambda i: (0, 0)),
            pl.BlockSpec((H2p, Op), lambda i: (0, 0)),
            pl.BlockSpec((1, Op), lambda i: (0, 0)),
            pl.BlockSpec((1, Op), lambda i: (0, 0)),
            pl.BlockSpec((1, Op), lambda i: (0, 0)),
        ],
        out_specs=pl.BlockSpec((TM, Op), lambda i: (i, 0)),
        compiler_params=pltpu.CompilerParams(
            dimension_semantics=("parallel",),
            vmem_limit_bytes=32 * 1024 * 1024,
        ),
    )(x_p, w1_p, b1_p, w2_p, b2_p, wh_p, bh_p, lo, hi)

    # Single narrow slice of the padded slab, then a cheap split.
    packed = out[:B, : 2 * action_dim]
    mean = packed[:, :action_dim]
    log_std = packed[:, action_dim:]
    return mean, log_std


def init_actor_sac_params(key, state_dim, action_dim, hidden_dim=256):
    """Matches the module's init: kaiming_uniform (relu gain), zero bias.

    Weights stored pre-transposed as [in_dim, out_dim]; biases as [1, D].
    """
    h2 = hidden_dim // 2

    def kaiming_uniform(k, fan_in, fan_out):
        bound = jnp.sqrt(6.0 / fan_in)  # gain=sqrt(2), bound=gain*sqrt(3/fan_in)
        return jax.random.uniform(k, (fan_in, fan_out), jnp.float32, -bound, bound)

    k1, k2, k3, k4 = jax.random.split(key, 4)
    return {
        "w1": kaiming_uniform(k1, state_dim, hidden_dim),
        "b1": jnp.zeros((1, hidden_dim), jnp.float32),
        "w2": kaiming_uniform(k2, hidden_dim, h2),
        "b2": jnp.zeros((1, h2), jnp.float32),
        "wm": kaiming_uniform(k3, h2, action_dim),
        "bm": jnp.zeros((1, action_dim), jnp.float32),
        "ws": kaiming_uniform(k4, h2, action_dim),
        "bs": jnp.zeros((1, action_dim), jnp.float32),
    }


def _reference_forward(state, params):
    h1 = jnp.maximum(state @ params["w1"] + params["b1"], 0.0)
    h2 = jnp.maximum(h1 @ params["w2"] + params["b2"], 0.0)
    mean = h2 @ params["wm"] + params["bm"]
    log_std = jnp.clip(h2 @ params["ws"] + params["bs"], LOG_STD_MIN, LOG_STD_MAX)
    return mean, log_std


if __name__ == "__main__":
    key = jax.random.PRNGKey(0)
    k_param, k_state = jax.random.split(key)

    batch = 2
    state_dim = 16
    action_dim = 4
    hidden_dim = 32

    params = init_actor_sac_params(k_param, state_dim, action_dim, hidden_dim)
    state = jax.random.normal(k_state, (batch, state_dim), jnp.float32)

    ref_mean, ref_log_std = _reference_forward(state, params)

    # f32-operand path: exact parity with the reference.
    prep_f32 = prepare_actor_sac_params(params, compute_dtype=jnp.float32)
    mean, log_std = actor_sac_forward(state, prep_f32, action_dim=action_dim)
    jax.block_until_ready((mean, log_std))
    assert mean.shape == (batch, action_dim)
    assert log_std.shape == (batch, action_dim)
    assert jnp.allclose(mean, ref_mean, atol=1e-5, rtol=1e-5)
    assert jnp.allclose(log_std, ref_log_std, atol=1e-5, rtol=1e-5)

    # Default bf16-operand / f32-accumulation path (bandwidth + MXU lever).
    prep_bf16 = prepare_actor_sac_params(params)  # compute_dtype=bf16 default
    mean_bf, log_std_bf = actor_sac_forward(state, prep_bf16, action_dim=action_dim)
    jax.block_until_ready((mean_bf, log_std_bf))
    assert jnp.allclose(mean_bf, ref_mean, atol=5e-2, rtol=5e-2)
    assert jnp.allclose(log_std_bf, ref_log_std, atol=5e-2, rtol=5e-2)

    # TODO(synk): ActorSAC.sample() (Normal.rsample + tanh-squash log-prob) is
    # host/JAX-side distribution logic; only the deterministic forward() is kernelized.

    print("KERNEL_OK")
</pallas_src>

<mosaic_0001>
module attributes {stable_mosaic.version = 11 : i64} {
  func.func @_actor_sac_kernel(%arg0: i32, %arg1: memref<8x16xf32, #tpu.memory_space<vmem>>, %arg2: memref<16x128xf32, #tpu.memory_space<vmem>>, %arg3: memref<1x128xf32, #tpu.memory_space<vmem>>, %arg4: memref<128x128xf32, #tpu.memory_space<vmem>>, %arg5: memref<1x128xf32, #tpu.memory_space<vmem>>, %arg6: memref<128x128xf32, #tpu.memory_space<vmem>>, %arg7: memref<1x128xf32, #tpu.memory_space<vmem>>, %arg8: memref<1x128xf32, #tpu.memory_space<vmem>>, %arg9: memref<1x128xf32, #tpu.memory_space<vmem>>, %arg10: memref<8x128xf32, #tpu.memory_space<vmem>>) attributes {dimension_semantics = [#tpu.dimension_semantics<parallel>], iteration_bounds = array<i64: 1>, scalar_prefetch = 0 : i64, scratch_operands = 0 : i64, tpu.core_type = #tpu.core_type<tc>, window_params = [{transform_indices = @transform_0, window_bounds = array<i64: 8, 16>}, {pipeline_mode = #tpu.pipeline_mode<synchronous>, transform_indices = @transform_1, window_bounds = array<i64: 16, 128>}, {pipeline_mode = #tpu.pipeline_mode<synchronous>, transform_indices = @transform_2, window_bounds = array<i64: 1, 128>}, {pipeline_mode = #tpu.pipeline_mode<synchronous>, transform_indices = @transform_3, window_bounds = array<i64: 128, 128>}, {pipeline_mode = #tpu.pipeline_mode<synchronous>, transform_indices = @transform_4, window_bounds = array<i64: 1, 128>}, {pipeline_mode = #tpu.pipeline_mode<synchronous>, transform_indices = @transform_5, window_bounds = array<i64: 128, 128>}, {pipeline_mode = #tpu.pipeline_mode<synchronous>, transform_indices = @transform_6, window_bounds = array<i64: 1, 128>}, {pipeline_mode = #tpu.pipeline_mode<synchronous>, transform_indices = @transform_7, window_bounds = array<i64: 1, 128>}, {pipeline_mode = #tpu.pipeline_mode<synchronous>, transform_indices = @transform_8, window_bounds = array<i64: 1, 128>}, {transform_indices = @transform_9, window_bounds = array<i64: 8, 128>}]} {
    %c0 = arith.constant 0 : index
    %c0_0 = arith.constant 0 : index
    %0 = vector.load %arg1[%c0, %c0_0] : memref<8x16xf32, #tpu.memory_space<vmem>>, vector<8x16xf32>
    %c0_1 = arith.constant 0 : index
    %c0_2 = arith.constant 0 : index
    %1 = vector.load %arg2[%c0_1, %c0_2] : memref<16x128xf32, #tpu.memory_space<vmem>>, vector<16x128xf32>
    %cst = arith.constant dense<0.000000e+00> : vector<8x128xf32>
    %2 = tpu.matmul %0, %1, %cst {dimension_numbers = #tpu.dot_dimension_numbers<[1], [0], [0], [1], [0, 0, 1, 1], [], []>} : vector<8x16xf32>, vector<16x128xf32>, vector<8x128xf32> -> vector<8x128xf32>
    %c0_3 = arith.constant 0 : index
    %c0_4 = arith.constant 0 : index
    %3 = vector.load %arg3[%c0_3, %c0_4] : memref<1x128xf32, #tpu.memory_space<vmem>>, vector<1x128xf32>
    %4 = vector.broadcast %3 : vector<1x128xf32> to vector<8x128xf32>
    %5 = arith.addf %2, %4 : vector<8x128xf32>
    %cst_5 = arith.constant 0.000000e+00 : f32
    %6 = vector.broadcast %cst_5 : f32 to vector<8x128xf32>
    %7 = arith.maximumf %5, %6 : vector<8x128xf32>
    %c0_6 = arith.constant 0 : index
    %c0_7 = arith.constant 0 : index
    %8 = vector.load %arg4[%c0_6, %c0_7] : memref<128x128xf32, #tpu.memory_space<vmem>>, vector<128x128xf32>
    %cst_8 = arith.constant dense<0.000000e+00> : vector<8x128xf32>
    %9 = tpu.matmul %7, %8, %cst_8 {dimension_numbers = #tpu.dot_dimension_numbers<[1], [0], [0], [1], [0, 0, 1, 1], [], []>} : vector<8x128xf32>, vector<128x128xf32>, vector<8x128xf32> -> vector<8x128xf32>
    %c0_9 = arith.constant 0 : index
    %c0_10 = arith.constant 0 : index
    %10 = vector.load %arg5[%c0_9, %c0_10] : memref<1x128xf32, #tpu.memory_space<vmem>>, vector<1x128xf32>
    %11 = vector.broadcast %10 : vector<1x128xf32> to vector<8x128xf32>
    %12 = arith.addf %9, %11 : vector<8x128xf32>
    %cst_11 = arith.constant 0.000000e+00 : f32
    %13 = vector.broadcast %cst_11 : f32 to vector<8x128xf32>
    %14 = arith.maximumf %12, %13 : vector<8x128xf32>
    %c0_12 = arith.constant 0 : index
    %c0_13 = arith.constant 0 : index
    %15 = vector.load %arg6[%c0_12, %c0_13] : memref<128x128xf32, #tpu.memory_space<vmem>>, vector<128x128xf32>
    %cst_14 = arith.constant dense<0.000000e+00> : vector<8x128xf32>
    %16 = tpu.matmul %14, %15, %cst_14 {dimension_numbers = #tpu.dot_dimension_numbers<[1], [0], [0], [1], [0, 0, 1, 1], [], []>} : vector<8x128xf32>, vector<128x128xf32>, vector<8x128xf32> -> vector<8x128xf32>
    %c0_15 = arith.constant 0 : index
    %c0_16 = arith.constant 0 : index
    %17 = vector.load %arg7[%c0_15, %c0_16] : memref<1x128xf32, #tpu.memory_space<vmem>>, vector<1x128xf32>
    %18 = vector.broadcast %17 : vector<1x128xf32> to vector<8x128xf32>
    %19 = arith.addf %16, %18 : vector<8x128xf32>
    %c0_17 = arith.constant 0 : index
    %c0_18 = arith.constant 0 : index
    %20 = vector.load %arg8[%c0_17, %c0_18] : memref<1x128xf32, #tpu.memory_space<vmem>>, vector<1x128xf32>
    %21 = vector.broadcast %20 : vector<1x128xf32> to vector<8x128xf32>
    %22 = arith.maximumf %19, %21 : vector<8x128xf32>
    %c0_19 = arith.constant 0 : index
    %c0_20 = arith.constant 0 : index
    %23 = vector.load %arg9[%c0_19, %c0_20] : memref<1x128xf32, #tpu.memory_space<vmem>>, vector<1x128xf32>
    %24 = vector.broadcast %23 : vector<1x128xf32> to vector<8x128xf32>
    %25 = arith.minimumf %22, %24 : vector<8x128xf32>
    %c0_21 = arith.constant 0 : index
    %c0_22 = arith.constant 0 : index
    %26 = vector.load %arg10[%c0_21, %c0_22] : memref<8x128xf32, #tpu.memory_space<vmem>>, vector<8x128xf32>
    tpu.vector_store %arg10[%c0_21, %c0_22], %25 {strides = array<i32>} : memref<8x128xf32, #tpu.memory_space<vmem>>, vector<8x128xf32>,
    return
  }
  func.func @transform_0(%arg0: i32) -> (i32, i32) {
    %c0_i32 = arith.constant 0 : i32
    %c0_i32_0 = arith.constant 0 : i32
    return %arg0, %c0_i32 : i32, i32
  }
  func.func @transform_1(%arg0: i32) -> (i32, i32) {
    %c0_i32 = arith.constant 0 : i32
    %c0_i32_0 = arith.constant 0 : i32
    %c0_i32_1 = arith.constant 0 : i32
    return %c0_i32, %c0_i32_0 : i32, i32
  }
  func.func @transform_2(%arg0: i32) -> (i32, i32) {
    %c0_i32 = arith.constant 0 : i32
    %c0_i32_0 = arith.constant 0 : i32
    %c0_i32_1 = arith.constant 0 : i32
    return %c0_i32, %c0_i32_0 : i32, i32
  }
  func.func @transform_3(%arg0: i32) -> (i32, i32) {
    %c0_i32 = arith.constant 0 : i32
    %c0_i32_0 = arith.constant 0 : i32
    %c0_i32_1 = arith.constant 0 : i32
    return %c0_i32, %c0_i32_0 : i32, i32
  }
  func.func @transform_4(%arg0: i32) -> (i32, i32) {
    %c0_i32 = arith.constant 0 : i32
    %c0_i32_0 = arith.constant 0 : i32
    %c0_i32_1 = arith.constant 0 : i32
    return %c0_i32, %c0_i32_0 : i32, i32
  }
  func.func @transform_5(%arg0: i32) -> (i32, i32) {
    %c0_i32 = arith.constant 0 : i32
    %c0_i32_0 = arith.constant 0 : i32
    %c0_i32_1 = arith.constant 0 : i32
    return %c0_i32, %c0_i32_0 : i32, i32
  }
  func.func @transform_6(%arg0: i32) -> (i32, i32) {
    %c0_i32 = arith.constant 0 : i32
    %c0_i32_0 = arith.constant 0 : i32
    %c0_i32_1 = arith.constant 0 : i32
    return %c0_i32, %c0_i32_0 : i32, i32
  }
  func.func @transform_7(%arg0: i32) -> (i32, i32) {
    %c0_i32 = arith.constant 0 : i32
    %c0_i32_0 = arith.constant 0 : i32
    %c0_i32_1 = arith.constant 0 : i32
    return %c0_i32, %c0_i32_0 : i32, i32
  }
  func.func @transform_8(%arg0: i32) -> (i32, i32) {
    %c0_i32 = arith.constant 0 : i32
    %c0_i32_0 = arith.constant 0 : i32
    %c0_i32_1 = arith.constant 0 : i32
    return %c0_i32, %c0_i32_0 : i32, i32
  }
  func.func @transform_9(%arg0: i32) -> (i32, i32) {
    %c0_i32 = arith.constant 0 : i32
    %c0_i32_0 = arith.constant 0 : i32
    return %arg0, %c0_i32 : i32, i32
  }
}

</mosaic_0001>

<bundles_post_ra>
// kernel: actor_sac_forward.1
= control target key start
LH: loop header
LB: loop body
LE: loop exit
PB: predicated region body
PF: predicated region fallthrough
CT: control target
= control target key end

     0   :  { %14 = vsyncpa [#allocation3], 0  ;;  %s546_s0 = inlined_call_operand.vmem [shape: f32[8,16], index: 0, kind: input, shape index: {}]   ;;  %s547_s1 = inlined_call_operand.vmem [shape: f32[16,128], index: 1, kind: input, shape index: {}]   ;;  %s548_s2 = inlined_call_operand.hbm [shape: f32[1,128], index: 2, kind: input, shape index: {}]   ;;  %s549_s3 = inlined_call_operand.hbm [shape: f32[128,128], index: 3, kind: input, shape index: {}]   ;;  %s550_s4 = inlined_call_operand.hbm [shape: f32[1,128], index: 4, kind: input, shape index: {}]   ;;  %s551_s5 = inlined_call_operand.hbm [shape: f32[128,128], index: 5, kind: input, shape index: {}]   ;;  %s552_s6 = inlined_call_operand.hbm [shape: f32[1,128], index: 6, kind: input, shape index: {}]   ;;  %s553_s7 = inlined_call_operand.hbm [shape: f32[1,128], index: 7, kind: input, shape index: {}]   ;;  %s554_s8 = inlined_call_operand.hbm [shape: f32[1,128], index: 8, kind: input, shape index: {}]   ;;  %s555_s9 = inlined_call_operand.vmem [shape: f32[8,128], index: 9, kind: output, shape index: {}]  }
   0x1   :  { %15 = vsyncpa [#allocation5], 0 }
   0x2   :  { %16 = vsyncpa [#allocation8], 0  ;;  %s37_s11 = sshll.u32 %s549_s3, 4  ;;  %s38_s11 = int_to_ptr.hbm [resolvable:$true] %s37_s11 }
   0x3   :  { %17 = vsyncpa [#allocation11], 0  ;;  %s454_s12 = smov [#allocation4]   ;;  %s61_s16 = sshll.u32 %s551_s5, 4  ;;  %s62_s16 = int_to_ptr.hbm [resolvable:$true] %s61_s16 }
   0x4   :  { %s39_s13 = sshll.u32 %s454_s12, 4  ;;  %s455_s17 = smov 128   ;;  %s40_s13 = int_to_ptr.vmem [resolvable:$true] %s39_s13 }
   0x5   :  { %s456_s18 = smov 8   ;;  %s457_s19 = smov [#allocation7]  }
   0x6   :  { %45 = dma.hbm_to_vmem [thread:$0]  %s38_s11, 2048, %s40_s13, [#allocation5], %s455_s17, %s455_s17, %s456_s18  }
   0x7   :  { %s63_s20 = sshll.u32 %s457_s19, 4  ;;  %s86_s23 = sshll.u32 %s553_s7, 4  ;;  %s64_s20 = int_to_ptr.vmem [resolvable:$true] %s63_s20  ;;  %s87_s23 = int_to_ptr.hbm [resolvable:$true] %s86_s23 }
   0x8   :  { %69 = dma.hbm_to_vmem [thread:$0]  %s62_s16, 2048, %s64_s20, [#allocation8], %s455_s17, %s455_s17, %s456_s18  }
   0x9   :  { %s27_s25 = sshll.u32 %s548_s2, 4  ;;  %s458_s26 = smov [#allocation10]   ;;  %s28_s25 = int_to_ptr.hbm [resolvable:$true] %s27_s25 }
   0xa   :  { %s88_s27 = sshll.u32 %s458_s26, 4  ;;  %s459_s5 = smov [#allocation2]   ;;  %s89_s27 = int_to_ptr.vmem [resolvable:$true] %s88_s27 }
   0xb   :  { %91 = dma.hbm_to_vmem [thread:$0]  %s87_s23, 16, %s89_s27, [#allocation11]  }
   0xc   :  { %s29_s28 = sshll.u32 %s459_s5, 4  ;;  %s51_s10 = sshll.u32 %s550_s4, 4  ;;  %s30_s28 = int_to_ptr.vmem [resolvable:$true] %s29_s28  ;;  %s52_s10 = int_to_ptr.hbm [resolvable:$true] %s51_s10 }
   0xd   :  { %32 = dma.hbm_to_vmem [thread:$0]  %s28_s25, 16, %s30_s28, [#allocation3]  }
   0xe   :  { %s75_s12 = sshll.u32 %s552_s6, 4  ;;  %s460_s13 = smov [#allocation6]   ;;  %s76_s12 = int_to_ptr.hbm [resolvable:$true] %s75_s12 }
   0xf   :  { %s53_s2 = sshll.u32 %s460_s13, 4  ;;  %s461_s14 = smov [#allocation9]   ;;  %s54_s2 = int_to_ptr.vmem [resolvable:$true] %s53_s2 }
  0x10   :  { %56 = dma.hbm_to_vmem [thread:$0]  %s52_s10, 16, %s54_s2, [#allocation5]  }
  0x11   :  { %s77_s15 = sshll.u32 %s461_s14, 4  ;;  %s97_s18 = sshll.u32 %s554_s8, 4  ;;  %s78_s15 = int_to_ptr.vmem [resolvable:$true] %s77_s15  ;;  %s98_s18 = int_to_ptr.hbm [resolvable:$true] %s97_s18 }
  0x12   :  { %80 = dma.hbm_to_vmem [thread:$0]  %s76_s12, 16, %s78_s15, [#allocation8]  }
  0x13   :  { %s462_s4 = smov [#allocation12]  }
  0x14   :  { %s99_s19 = sshll.u32 %s462_s4, 4  ;;  %s100_s19 = int_to_ptr.vmem [resolvable:$true] %s99_s19 }
  0x15   :  { %102 = dma.hbm_to_vmem [thread:$0]  %s98_s18, 16, %s100_s19, [#allocation11]  }
  0x16   :  { %446 = dma.done.wait [#allocation3], 16  }
  0x17   :  { %447 = vsyncadd [#allocation3], 4294967280 }
  0x18   :  { %448 = dma.done.wait [#allocation5], 2064  }
  0x19   :  { %449 = vsyncadd [#allocation5], 4294965232 }
  0x1a   :  { %450 = dma.done.wait [#allocation8], 2064  }
  0x1b   :  { %451 = vsyncadd [#allocation8], 4294965232 }
  0x1c   :  { %452 = dma.done.wait [#allocation11], 32  }
  0x1d   :  { %453 = vsyncadd [#allocation11], 4294967264  ;;  %v133_v0 = vld [vmem:[%s547_s1 + $0x8] sm:$0xff]  ;;  %v132_v1 = vld [vmem:[%s547_s1] sm:$0xff]  ;;  %vm138_vm0 = vcmask 130048  }
  0x1e   :  { %156 = vmatpush.msra.mxu0 %v133_v0  ;;  %v131_v2 = vld [vmem:[%s546_s0] sm:$0xff]  ;;  %v177_v4 = vld [vmem:[#allocation4 + $0x70] sm:$0xff]  ;;  %v176_v5 = vld [vmem:[#allocation4 + $0x68] sm:$0xff] }
  0x1f   :  { %v178_v3 = vld [vmem:[#allocation4 + $0x78] sm:$0xff]  ;;  %v175_v6 = vld [vmem:[#allocation4 + $0x60] sm:$0xff]  ;;  %v173_v8 = vld [vmem:[#allocation4 + $0x50] sm:$0xff] }
  0x20   :  { %183 = vmatpush.msra.mxu1 %v178_v3  ;;  %157 = vmatpush.msra.mxu0 %v132_v1  ;;  %v174_v7 = vld [vmem:[#allocation4 + $0x58] sm:$0xff]  ;;  %v172_v9 = vld [vmem:[#allocation4 + $0x48] sm:$0xff]  ;;  %v171_v10 = vld [vmem:[#allocation4 + $0x40] sm:$0xff] }
  0x21   :  { %263 = vmatmul.msk.f32.vlgmr.msra.gmra.mxu0 %vm138_vm0, %v131_v2  ;;  %v170_v11 = vld [vmem:[#allocation4 + $0x38] sm:$0xff]  ;;  %v169_v12 = vld [vmem:[#allocation4 + $0x30] sm:$0xff]  ;;  %v168_v13 = vld [vmem:[#allocation4 + $0x28] sm:$0xff] }
  0x22   :  { %184 = vmatpush.msra.mxu1 %v177_v4  ;;  %v167_v14 = vld [vmem:[#allocation4 + $0x20] sm:$0xff]  ;;  %v166_v15 = vld [vmem:[#allocation4 + $0x18] sm:$0xff]  ;;  %v165_v16 = vld [vmem:[#allocation4 + $0x10] sm:$0xff] }
  0x23   :  { %v164_v17 = vld [vmem:[#allocation4 + $0x8] sm:$0xff]  ;;  %v163_v18 = vld [vmem:[#allocation4] sm:$0xff]  ;;  %v218_v20 = vld [vmem:[#allocation7 + $0x70] sm:$0xff] }
  0x24   :  { %185 = vmatpush.msra.mxu1 %v176_v5  ;;  %v219_v19 = vld [vmem:[#allocation7 + $0x78] sm:$0xff]  ;;  %v217_v21 = vld [vmem:[#allocation7 + $0x68] sm:$0xff]  ;;  %v216_v22 = vld [vmem:[#allocation7 + $0x60] sm:$0xff] }
  0x25   :  { %224 = vmatpush.msra.mxu2 %v219_v19  ;;  %v215_v23 = vld [vmem:[#allocation7 + $0x58] sm:$0xff]  ;;  %v214_v24 = vld [vmem:[#allocation7 + $0x50] sm:$0xff]  ;;  %v213_v25 = vld [vmem:[#allocation7 + $0x48] sm:$0xff] }
  0x26   :  { %186 = vmatpush.msra.mxu1 %v175_v6  ;;  %v212_v26 = vld [vmem:[#allocation7 + $0x40] sm:$0xff]  ;;  %v211_v27 = vld [vmem:[#allocation7 + $0x38] sm:$0xff]  ;;  %v210_v28 = vld [vmem:[#allocation7 + $0x30] sm:$0xff] }
  0x27   :  { %225 = vmatpush.msra.mxu2 %v218_v20  ;;  %v209_v29 = vld [vmem:[#allocation7 + $0x28] sm:$0xff]  ;;  %v208_v30 = vld [vmem:[#allocation7 + $0x20] sm:$0xff]  ;;  %v207_v31 = vld [vmem:[#allocation7 + $0x18] sm:$0xff] }
  0x28   :  { %187 = vmatpush.msra.mxu1 %v174_v7  ;;  %v273_v32 = vld [vmem:[#allocation2] ss:$0 sm:$0xff]  ;;  %v206_v36 = vld [vmem:[#allocation7 + $0x10] sm:$0xff]  ;;  %v205_v37 = vld [vmem:[#allocation7 + $0x8] sm:$0xff] }
  0x29   :  { %226 = vmatpush.msra.mxu2 %v217_v21  ;;  %v204_v38 = vld [vmem:[#allocation7] sm:$0xff]  ;;  %v274_v39 = vld [vmem:[#allocation6] ss:$0 sm:$0xff] }
  0x2a   :  { %188 = vmatpush.msra.mxu1 %v173_v8  ;;  %v275_v43 = vld [vmem:[#allocation9] ss:$0 sm:$0xff]  ;;  %v276_v44 = vld [vmem:[#allocation10] ss:$0 sm:$0xff]  ;;  %v277_v47 = vld [vmem:[#allocation12] ss:$0 sm:$0xff] }
  0x2b   :  { %227 = vmatpush.msra.mxu2 %v216_v22 }
  0x2c   :  { %189 = vmatpush.msra.mxu1 %v172_v9 }
  0x2d   :  { %228 = vmatpush.msra.mxu2 %v215_v23 }
  0x2e   :  { %190 = vmatpush.msra.mxu1 %v171_v10 }
  0x2f   :  { %229 = vmatpush.msra.mxu2 %v214_v24 }
  0x30   :  { %191 = vmatpush.msra.mxu1 %v170_v11 }
  0x31   :  { %230 = vmatpush.msra.mxu2 %v213_v25 }
  0x32   :  { %192 = vmatpush.msra.mxu1 %v169_v12 }
  0x33   :  { %231 = vmatpush.msra.mxu2 %v212_v26 }
  0x34   :  { %193 = vmatpush.msra.mxu1 %v168_v13 }
  0x35   :  { %232 = vmatpush.msra.mxu2 %v211_v27 }
  0x36   :  { %194 = vmatpush.msra.mxu1 %v167_v14 }
  0x37   :  { %233 = vmatpush.msra.mxu2 %v210_v28 }
  0x38   :  { %195 = vmatpush.msra.mxu1 %v166_v15 }
  0x39   :  { %234 = vmatpush.msra.mxu2 %v209_v29 }
  0x3a   :  { %196 = vmatpush.msra.mxu1 %v165_v16 }
  0x3b   :  { %235 = vmatpush.msra.mxu2 %v208_v30 }
  0x3c   :  { %197 = vmatpush.msra.mxu1 %v164_v17 }
  0x3d   :  { %236 = vmatpush.msra.mxu2 %v207_v31 }
  0x3e   :  { %198 = vmatpush.msra.mxu1 %v163_v18 }
  0x3f   :  { %237 = vmatpush.msra.mxu2 %v206_v36 }
  0x41   :  { %238 = vmatpush.msra.mxu2 %v205_v37 }
  0x43   :  { %239 = vmatpush.msra.mxu2 %v204_v38 }
  0x9e   :  { %v159_v33 = vpop.f32.mrf.mxu0 }
  0x9f   :  { %v160_v34 = vadd.f32 %v273_v32, %v159_v33 }
  0xa1   :  { %v162_v35 = vmax.f32 %v160_v34, 0.0 }
  0xa3   :  { %199 = vmatmul.f32.vlgmr.msra.gmra.mxu1 %v162_v35 }
 0x120   :  { %v200_v40 = vpop.f32.mrf.mxu1 }
 0x121   :  { %v201_v41 = vadd.f32 %v274_v39, %v200_v40 }
 0x123   :  { %v203_v42 = vmax.f32 %v201_v41, 0.0 }
 0x125   :  { %240 = vmatmul.f32.vlgmr.msra.gmra.mxu2 %v203_v42 }
 0x1a8   :  { %v241_v45 = vpop.f32.mrf.mxu2 }
 0x1a9   :  { %v242_v46 = vadd.f32 %v275_v43, %v241_v45 }
 0x1ab   :  { %v248_v48 = vmax.f32 %v242_v46, %v276_v44 }
 0x1ad   :  { %v253_v49 = vmin.f32 %v248_v48, %v277_v47 }
 0x1af   :  { %254 = vst [vmem:[%s555_s9] sm:$0xff] %v253_v49 }
 0x1b0   :  { %259 = vsyncpa [#allocation3], 1 }
 0x1b1   :  { %260 = vsyncpa [#allocation5], 1 }
 0x1b2   :  { %261 = vsyncpa [#allocation8], 1 }
 0x1b3   :  { %262 = vsyncpa [#allocation11], 1 }

</bundles_post_ra>
